<compile_context>
chip_gen: v7x
topology: tpu7x:2x2x1
jax: 0.10.0
libtpu: 0.0.40
codegen_flags: <defaults>
</compile_context>

<pallas_src>
import functools

import jax
import jax.numpy as jnp
from jax.experimental import pallas as pl
from jax.experimental.pallas import tpu as pltpu


def _round_up(x: int, m: int) -> int:
    return ((x + m - 1) // m) * m


def _timestep_embed_kernel(t_ref, w_ref, b_ref, o_ref, *, approximate):
    # t_ref: (TB, 1), w_ref: (1, E), b_ref: (1, E), o_ref: (TB, E)
    t = t_ref[...]                       # (TB, 1)
    w = w_ref[...]                       # (1, E)
    b = b_ref[...]                       # (1, E)
    # Linear(1, E): broadcast outer product on the VPU (no MXU for K=1).
    x = t * w + b                        # (TB, E), f32
    if approximate:
        # tanh-approx GELU: 0.5*x*(1 + tanh(sqrt(2/pi)*(x + 0.044715*x^3)))
        # tanh lowers to the EUP -> frees the VALU, restores the write-bound
        # roofline on v6e/v7x.
        c = jnp.float32(0.7978845608028654)          # sqrt(2/pi)
        y = 0.5 * x * (1.0 + jnp.tanh(c * (x + 0.044715 * (x * x * x))))
    else:
        # Exact erf GELU: matches nn.GELU() default numerics (slower on VALU).
        y = 0.5 * x * (1.0 + jax.lax.erf(x * jnp.float32(0.7071067811865476)))
    o_ref[...] = y.astype(o_ref.dtype)


@functools.partial(jax.jit,
                   static_argnames=("out_dtype", "approximate", "block_b"))
def timestep_embedder(t, weight, bias, *, out_dtype=jnp.float32,
                      approximate=True, block_b=512):
    """t: (B,), weight: (embed_dim, 1), bias: (embed_dim,) -> (B, embed_dim).

    out_dtype=jnp.bfloat16 halves HBM write traffic (recommended when the
    consumer tolerates bf16).  approximate=False reproduces nn.GELU's erf
    numerics exactly (slower on v6e/v7x).
    """
    B = t.shape[0]
    E = weight.shape[0]

    t2 = t.reshape(B, 1).astype(jnp.float32)
    w2 = weight.reshape(1, E).astype(jnp.float32)    # w2[0, e] = weight[e, 0]
    b2 = bias.reshape(1, E).astype(jnp.float32)

    # ---- batch-tile selection ------------------------------------------------
    itemsize = jnp.dtype(out_dtype).itemsize
    row_bytes = _round_up(E, 128) * itemsize         # VMEM bytes per output row
    # Keep the output double-buffer <= ~16 MiB (8 MiB per buffer); the t block
    # is lane-padded to tb x 128 (~tb*512 B/buffer) which is negligible here.
    vmem_cap_tb = max(16, ((8 * 1024 * 1024) // row_bytes) // 16 * 16)
    tb = min(block_b, vmem_cap_tb)
    if B > 16:
        # Guarantee >= 2 grid tiles so v7x's two TensorCores both get work.
        tb = min(tb, _round_up(-(-B // 2), 16))
    else:
        tb = 16
    tb = max(16, (tb // 16) * 16)                    # multiple of 16: bf16-safe

    grid = (pl.cdiv(B, tb),)                         # ragged last tile is fine:
                                                     # OOB output rows are masked

    kernel = functools.partial(_timestep_embed_kernel, approximate=approximate)

    out = pl.pallas_call(
        kernel,
        out_shape=jax.ShapeDtypeStruct((B, E), out_dtype),   # exact shape: no
        grid=grid,                                            # pad / slice-back
        in_specs=[
            pl.BlockSpec((tb, 1), lambda i: (i, 0)),   # t tile, marches over B
            pl.BlockSpec((1, E), lambda i: (0, 0)),    # weight, stays resident
            pl.BlockSpec((1, E), lambda i: (0, 0)),    # bias, stays resident
        ],
        out_specs=pl.BlockSpec((tb, E), lambda i: (i, 0)),
        compiler_params=pltpu.CompilerParams(
            dimension_semantics=("parallel",),
            vmem_limit_bytes=64 * 1024 * 1024,         # v5e default (16 MiB) is
        ),                                             # too tight for large E
    )(t2, w2, b2)

    return out


def _reference(t, weight, bias, approximate):
    x = t.reshape(-1, 1).astype(jnp.float32) @ weight.T + bias
    return jax.nn.gelu(x, approximate=approximate)


if __name__ == "__main__":
    key = jax.random.PRNGKey(0)
    k_t, k_w, k_b, k_t2, k_w2, k_b2, k_t3 = jax.random.split(key, 7)

    # --- small, nn.Linear(1, E)-consistent shapes ---------------------------
    B, E = 8, 128
    # fan_in=1 -> nn.Linear init range uniform(-1, 1) for weight and bias.
    weight = jax.random.uniform(k_w, (E, 1), jnp.float32, -1.0, 1.0)
    bias = jax.random.uniform(k_b, (E,), jnp.float32, -1.0, 1.0)
    t = jax.random.uniform(k_t, (B,), jnp.float32, 0.0, 1000.0)

    # Default path: tanh-approx GELU (EUP), f32 out.
    out = jax.block_until_ready(timestep_embedder(t, weight, bias))
    ref = _reference(t, weight, bias, approximate=True)
    assert out.shape == (B, E)
    assert jnp.allclose(out, ref, atol=1e-4, rtol=1e-4)

    # Exact erf path matches nn.GELU() default numerics.
    out_exact = jax.block_until_ready(
        timestep_embedder(t, weight, bias, approximate=False))
    ref_exact = _reference(t, weight, bias, approximate=False)
    assert jnp.allclose(out_exact, ref_exact, atol=1e-4, rtol=1e-4)

    # --- ragged / non-aligned case exercises the masked-edge path -----------
    B2, E2 = 13, 96
    w_r = jax.random.uniform(k_w2, (E2, 1), jnp.float32, -1.0, 1.0)
    b_r = jax.random.uniform(k_b2, (E2,), jnp.float32, -1.0, 1.0)
    t_r = jax.random.uniform(k_t2, (B2,), jnp.float32, 0.0, 1000.0)
    out_r = jax.block_until_ready(timestep_embedder(t_r, w_r, b_r))
    ref_r = _reference(t_r, w_r, b_r, approximate=True)
    assert out_r.shape == (B2, E2)
    assert jnp.allclose(out_r, ref_r, atol=1e-4, rtol=1e-4)

    # --- bf16 output path (halved HBM writes), multi-tile grid --------------
    B3, E3 = 32, 256
    t_b = jax.random.uniform(k_t3, (B3,), jnp.float32, 0.0, 1000.0)
    w_b = jax.random.uniform(k_w2, (E3, 1), jnp.float32, -1.0, 1.0)
    b_b = jax.random.uniform(k_b2, (E3,), jnp.float32, -1.0, 1.0)
    out_b = jax.block_until_ready(
        timestep_embedder(t_b, w_b, b_b, out_dtype=jnp.bfloat16))
    ref_b = _reference(t_b, w_b, b_b, approximate=True)
    assert out_b.shape == (B3, E3) and out_b.dtype == jnp.bfloat16
    assert jnp.allclose(out_b.astype(jnp.float32), ref_b, atol=1e-2, rtol=2e-2)

    print("KERNEL_OK")
</pallas_src>

<mosaic_0001>
module attributes {stable_mosaic.version = 11 : i64} {
  func.func @_timestep_embed_kernel(%arg0: i32, %arg1: memref<16x1xf32, #tpu.memory_space<vmem>>, %arg2: memref<1x128xf32, #tpu.memory_space<vmem>>, %arg3: memref<1x128xf32, #tpu.memory_space<vmem>>, %arg4: memref<16x128xf32, #tpu.memory_space<vmem>>) attributes {dimension_semantics = [#tpu.dimension_semantics<parallel>], iteration_bounds = array<i64: 1>, scalar_prefetch = 0 : i64, scratch_operands = 0 : i64, tpu.core_type = #tpu.core_type<tc>, window_params = [{transform_indices = @transform_0, window_bounds = array<i64: 16, 1>}, {pipeline_mode = #tpu.pipeline_mode<synchronous>, transform_indices = @transform_1, window_bounds = array<i64: 1, 128>}, {pipeline_mode = #tpu.pipeline_mode<synchronous>, transform_indices = @transform_2, window_bounds = array<i64: 1, 128>}, {transform_indices = @transform_3, window_bounds = array<i64: 16, 128>}]} {
    %c0 = arith.constant 0 : index
    %c0_0 = arith.constant 0 : index
    %0 = vector.load %arg1[%c0, %c0_0] : memref<16x1xf32, #tpu.memory_space<vmem>>, vector<16x1xf32>
    %c0_1 = arith.constant 0 : index
    %c0_2 = arith.constant 0 : index
    %1 = vector.load %arg2[%c0_1, %c0_2] : memref<1x128xf32, #tpu.memory_space<vmem>>, vector<1x128xf32>
    %c0_3 = arith.constant 0 : index
    %c0_4 = arith.constant 0 : index
    %2 = vector.load %arg3[%c0_3, %c0_4] : memref<1x128xf32, #tpu.memory_space<vmem>>, vector<1x128xf32>
    %3 = vector.broadcast %0 : vector<16x1xf32> to vector<16x128xf32>
    %4 = vector.broadcast %1 : vector<1x128xf32> to vector<16x128xf32>
    %5 = arith.mulf %3, %4 : vector<16x128xf32>
    %6 = vector.broadcast %2 : vector<1x128xf32> to vector<16x128xf32>
    %7 = arith.addf %5, %6 : vector<16x128xf32>
    %cst = arith.constant 5.000000e-01 : f32
    %8 = vector.broadcast %cst : f32 to vector<16x128xf32>
    %9 = arith.mulf %8, %7 : vector<16x128xf32>
    %10 = arith.mulf %7, %7 : vector<16x128xf32>
    %11 = arith.mulf %10, %7 : vector<16x128xf32>
    %cst_5 = arith.constant 4.471500e-02 : f32
    %12 = vector.broadcast %cst_5 : f32 to vector<16x128xf32>
    %13 = arith.mulf %12, %11 : vector<16x128xf32>
    %14 = arith.addf %7, %13 : vector<16x128xf32>
    %cst_6 = arith.constant 0.797884583 : f32
    %15 = vector.broadcast %cst_6 : f32 to vector<16x128xf32>
    %16 = arith.mulf %15, %14 : vector<16x128xf32>
    %17 = math.tanh %16 : vector<16x128xf32>
    %cst_7 = arith.constant 1.000000e+00 : f32
    %18 = vector.broadcast %cst_7 : f32 to vector<16x128xf32>
    %19 = arith.addf %18, %17 : vector<16x128xf32>
    %20 = arith.mulf %9, %19 : vector<16x128xf32>
    %c0_8 = arith.constant 0 : index
    %c0_9 = arith.constant 0 : index
    %21 = vector.load %arg4[%c0_8, %c0_9] : memref<16x128xf32, #tpu.memory_space<vmem>>, vector<16x128xf32>
    tpu.vector_store %arg4[%c0_8, %c0_9], %20 {strides = array<i32>} : memref<16x128xf32, #tpu.memory_space<vmem>>, vector<16x128xf32>,
    return
  }
  func.func @transform_0(%arg0: i32) -> (i32, i32) {
    %c0_i32 = arith.constant 0 : i32
    %c0_i32_0 = arith.constant 0 : i32
    return %arg0, %c0_i32 : i32, i32
  }
  func.func @transform_1(%arg0: i32) -> (i32, i32) {
    %c0_i32 = arith.constant 0 : i32
    %c0_i32_0 = arith.constant 0 : i32
    %c0_i32_1 = arith.constant 0 : i32
    return %c0_i32, %c0_i32_0 : i32, i32
  }
  func.func @transform_2(%arg0: i32) -> (i32, i32) {
    %c0_i32 = arith.constant 0 : i32
    %c0_i32_0 = arith.constant 0 : i32
    %c0_i32_1 = arith.constant 0 : i32
    return %c0_i32, %c0_i32_0 : i32, i32
  }
  func.func @transform_3(%arg0: i32) -> (i32, i32) {
    %c0_i32 = arith.constant 0 : i32
    %c0_i32_0 = arith.constant 0 : i32
    return %arg0, %c0_i32 : i32, i32
  }
}

</mosaic_0001>

<bundles_post_ra>
// kernel: timestep_embedder.1
= control target key start
LH: loop header
LB: loop body
LE: loop exit
PB: predicated region body
PF: predicated region fallthrough
CT: control target
= control target key end

     0   :  { %8 = vsyncpa [#allocation3], 0  ;;  %s317_s0 = inlined_call_operand.hbm [shape: f32[8,1], index: 0, kind: input, shape index: {}]   ;;  %s318_s1 = inlined_call_operand.hbm [shape: f32[1,128], index: 1, kind: input, shape index: {}]   ;;  %s319_s2 = inlined_call_operand.hbm [shape: f32[1,128], index: 2, kind: input, shape index: {}]   ;;  %s320_s3 = inlined_call_operand.hbm [shape: f32[8,128], index: 3, kind: output, shape index: {}]  }
   0x1   :  { %9 = vsyncpa [#allocation6], 0 }
   0x2   :  { %10 = vsyncpa [#allocation4], 0 }
   0x3   :  { %15 = vsyncadd [#allocation3], 128  ;;  %s228_s12 = smov [#allocation5]   ;;  %s229_s14 = smov [#allocation2]  }
   0x4   :  { %s29_s13 = sshll.u32 %s228_s12, 4  ;;  %s16_s15 = sshll.u32 %s229_s14, 4  ;;  %s30_s13 = int_to_ptr.vmem [resolvable:$true] %s29_s13  ;;  %s255_s15 = int_to_ptr.vmem [resolvable:$true] %s16_s15 }
   0x5   :  { %s134_s18 = scalar_lea.hbm %s318_s1, 16 }
   0x6   :  { %p135_p0 = scmp.ne.s32.totalorder %s318_s1, %s134_s18  ;;  %p138_p1 = scmp.lt.u32.totalorder %s134_s18, %s318_s1 }
   0x8   :  { %p140_p2 = pnand %p138_p1, %p135_p0 }
   0xa   :  { %143 = shalt.err (!%p140_p2)
}
   0xb   :  { %s144_s23 = scalar_lea.vmem %s30_s13, 16  ;;  %s148_s24 = scalar_lea.vmem %s30_s13, 32 }
   0xc   :  { %p145_p3 = scmp.ne.s32.totalorder %s30_s13, %s144_s23  ;;  %p149_p4 = scmp.lt.s32.totalorder %s30_s13, %s30_s13 }
   0xd   :  { %p150_p5 = scmp.lt.s32.totalorder %s148_s24, %s144_s23 }
   0xf   :  { %p151_p6 = por %p150_p5, %p149_p4 }
  0x11   :  { %p152_p7 = pnand %p151_p6, %p145_p3 }
  0x13   :  { %155 = shalt.err (!%p152_p7)
}
  0x14   :  { %32 = dma.hbm_to_vmem [thread:$0]  %s318_s1, 16, %s30_s13, [#allocation6]  }
  0x15   :  { %s156_s29 = scalar_lea.hbm %s317_s0, 128 }
  0x16   :  { %p157_p8 = scmp.ne.s32.totalorder %s317_s0, %s156_s29  ;;  %p160_p9 = scmp.lt.u32.totalorder %s156_s29, %s317_s0 }
  0x18   :  { %p162_p10 = pnand %p160_p9, %p157_p8 }
  0x1a   :  { %165 = shalt.err (!%p162_p10)
}
  0x1b   :  { %s166_s7 = scalar_lea.vmem %s255_s15, 128  ;;  %s170_s1 = scalar_lea.vmem %s255_s15, 256 }
  0x1c   :  { %p167_p11 = scmp.ne.s32.totalorder %s255_s15, %s166_s7  ;;  %p171_p12 = scmp.lt.s32.totalorder %s255_s15, %s255_s15 }
  0x1d   :  { %p172_p13 = scmp.lt.s32.totalorder %s170_s1, %s166_s7 }
  0x1f   :  { %p173_p0 = por %p172_p13, %p171_p12 }
  0x21   :  { %p174_p1 = pnand %p173_p0, %p167_p11 }
  0x23   :  { %177 = shalt.err (!%p174_p1)
}
  0x24   :  { %s230_s8 = smov 128   ;;  %s231_s9 = smov 8  }
  0x25   :  { %22 = dma.hbm_to_vmem [thread:$0]  %s317_s0, 128, %s255_s15, [#allocation3], %s230_s8, %s230_s8, %s231_s9  }
  0x26   :  { %s232_s12 = smov [#allocation7]   ;;  %s178_s17 = scalar_lea.hbm %s319_s2, 16 }
  0x27   :  { %s39_s13 = sshll.u32 %s232_s12, 4  ;;  %p179_p2 = scmp.ne.s32.totalorder %s319_s2, %s178_s17  ;;  %s40_s13 = int_to_ptr.vmem [resolvable:$true] %s39_s13 }
  0x28   :  { %p182_p3 = scmp.lt.u32.totalorder %s178_s17, %s319_s2 }
  0x2a   :  { %p184_p4 = pnand %p182_p3, %p179_p2 }
  0x2c   :  { %187 = shalt.err (!%p184_p4)
}
  0x2d   :  { %s188_s22 = scalar_lea.vmem %s40_s13, 16  ;;  %s192_s0 = scalar_lea.vmem %s40_s13, 32 }
  0x2e   :  { %p189_p5 = scmp.ne.s32.totalorder %s40_s13, %s188_s22  ;;  %p193_p6 = scmp.lt.s32.totalorder %s40_s13, %s40_s13 }
  0x2f   :  { %p194_p7 = scmp.lt.s32.totalorder %s192_s0, %s188_s22 }
  0x31   :  { %p195_p8 = por %p194_p7, %p193_p6 }
  0x33   :  { %p196_p9 = pnand %p195_p8, %p189_p5 }
  0x35   :  { %199 = shalt.err (!%p196_p9)
}
  0x36   :  { %42 = dma.hbm_to_vmem [thread:$0]  %s319_s2, 16, %s40_s13, [#allocation6]  }
  0x37   :  { %222 = dma.done.wait [#allocation3], 256  }
  0x38   :  { %223 = vsyncadd [#allocation3], 4294967040 }
  0x39   :  { %224 = dma.done.wait [#allocation6], 32  }
  0x3a   :  { %225 = vsyncadd [#allocation6], 4294967264  ;;  %v233_v0 = vmov 0   ;;  %v52_v1 = vld [vmem:[#allocation2] sm:$0xff]  ;;  %v53_v2 = vld [vmem:[#allocation2 + $0x8] sm:$0xff] }
  0x3b   :  { %129 = vset.pattern.permute.xlu0 %v233_v0  ;;  %v120_v3 = vld [vmem:[#allocation5] ss:$0 sm:$0xff]  ;;  %v121_v4 = vld [vmem:[#allocation7] ss:$0 sm:$0xff] }
  0x3c   :  { %58 = vperm.xlu0 %129, %v52_v1  }
  0x40   :  { %63 = vperm.xlu0 %129, %v53_v2  }
  0xbb   :  { %v59_v5 = vpop.permute.xlu0 %58 }
  0xbc   :  { %v72_v6 = vmul.f32 %v120_v3, %v59_v5 }
  0xbe   :  { %v80_v7 = vadd.f32 %v121_v4, %v72_v6 }
  0xbf   :  { %v64_v8 = vpop.permute.xlu0 %63 }
  0xc0   :  { %v84_v9 = vmul.f32 %v80_v7, %v80_v7  ;;  %v73_v10 = vmul.f32 %v120_v3, %v64_v8  ;;  %v82_v22 = vmul.f32 0.5, %v80_v7 }
  0xc2   :  { %v86_v11 = vmul.f32 %v84_v9, %v80_v7  ;;  %v81_v12 = vadd.f32 %v121_v4, %v73_v10 }
  0xc4   :  { %v88_v13 = vmul.f32 0.044715, %v86_v11  ;;  %v85_v14 = vmul.f32 %v81_v12, %v81_v12  ;;  %v83_v26 = vmul.f32 0.5, %v81_v12 }
  0xc6   :  { %v90_v15 = vadd.f32 %v88_v13, %v80_v7  ;;  %v87_v16 = vmul.f32 %v85_v14, %v81_v12 }
  0xc8   :  { %v92_v17 = vmul.f32 0.7978846, %v90_v15  ;;  %v89_v18 = vmul.f32 0.044715, %v87_v16 }
  0xca   :  { %130 = vtanh.f32 %v92_v17  ;;  %v91_v19 = vadd.f32 %v89_v18, %v81_v12 }
  0xcc   :  { %v93_v20 = vmul.f32 0.7978846, %v91_v19 }
  0xce   :  { %132 = vtanh.f32 %v93_v20 }
  0xd4   :  { %v131_v21 = vpop.eup %130 }
  0xd5   :  { %v96_v23 = vadd.f32 1.0, %v131_v21 }
  0xd7   :  { %v98_v24 = vmul.f32 %v96_v23, %v82_v22 }
  0xd8   :  { %v133_v25 = vpop.eup %132 }
  0xd9   :  { %100 = vst [vmem:[#allocation8] sm:$0xff] %v98_v24  ;;  %v97_v27 = vadd.f32 1.0, %v133_v25 }
  0xdb   :  { %v99_v28 = vmul.f32 %v97_v27, %v83_v26 }
  0xdd   :  { %101 = vst [vmem:[#allocation8 + $0x8] sm:$0xff] %v99_v28 }
  0xde   :  { %106 = vsyncadd [#allocation4], 128  ;;  %s234_s2 = smov [#allocation8]  }
  0xdf   :  { %s107_s24 = sshll.u32 %s234_s2, 4  ;;  %s108_s24 = int_to_ptr.vmem [resolvable:$true] %s107_s24 }
  0xe0   :  { %s200_s25 = scalar_lea.vmem %s108_s24, 128  ;;  %s204_s26 = scalar_lea.vmem %s108_s24, 256 }
  0xe1   :  { %p201_p10 = scmp.ne.s32.totalorder %s108_s24, %s200_s25  ;;  %p205_p11 = scmp.lt.s32.totalorder %s108_s24, %s108_s24 }
  0xe2   :  { %p206_p12 = scmp.lt.s32.totalorder %s204_s26, %s200_s25 }
  0xe4   :  { %p207_p13 = por %p206_p12, %p205_p11 }
  0xe6   :  { %p208_p0 = pnand %p207_p13, %p201_p10 }
  0xe8   :  { %211 = shalt.err (!%p208_p0)
}
  0xe9   :  { %s212_s29 = scalar_lea.hbm %s320_s3, 128 }
  0xea   :  { %p213_p1 = scmp.ne.s32.totalorder %s320_s3, %s212_s29  ;;  %p216_p2 = scmp.lt.u32.totalorder %s212_s29, %s320_s3 }
  0xec   :  { %p218_p3 = pnand %p216_p2, %p213_p1 }
  0xee   :  { %221 = shalt.err (!%p218_p3)
}
  0xef   :  { %113 = dma.vmem_to_hbm [thread:$0]  %s108_s24, 128, %s320_s3, [#allocation4], %s230_s8, %s230_s8, %s231_s9  }
  0xf0   :  { %226 = dma.done.wait [#allocation4], 256  }
  0xf1   :  { %227 = vsyncadd [#allocation4], 4294967040 }
  0xf2   :  { %117 = vsyncpa [#allocation3], 1 }
  0xf3   :  { %118 = vsyncpa [#allocation6], 1 }
  0xf4   :  { %119 = vsyncpa [#allocation4], 1 }

</bundles_post_ra>
